<compile_context>
chip_gen: v7x
topology: tpu7x:2x2x1
jax: 0.10.0
libtpu: 0.0.40
codegen_flags: <defaults>
</compile_context>

<pallas_src>
import functools

import jax
import jax.numpy as jnp
from jax.experimental import pallas as pl
from jax.experimental.pallas import tpu as pltpu

IN_FEATURES = 28 * 28   # 784
OUT_FEATURES = 10
OUT_PAD = 128           # lane-dense padded output width
DROP_P = 0.5


def _round_up(n, m):
    return ((n + m - 1) // m) * m


def _fc1_kernel(seed_ref, x_ref, w_ref, b_ref, o_ref, *, apply_dropout):
    """One batch tile.

    seed_ref : SMEM (1,)  int32    -- scalar-prefetched dropout seed
    x_ref    : VMEM (TB, 784)      -- batch tile of flattened inputs
    w_ref    : VMEM (784, 128)     -- weight, padded to 128 lanes (resident)
    b_ref    : VMEM (1, 128)       -- bias, padded to 128 lanes  (resident)
    o_ref    : VMEM (TB, 128)      -- lane-dense output tile
    """
    x = x_ref[...]

    if apply_dropout:
        tb, nf = x_ref.shape
        # Counter-based hash PRNG (lowbias32 mix) keyed by the *global*
        # element index and the seed -> i.i.d. Bernoulli mask across tiles.
        # (Portable: works under interpret mode; pltpu.prng_* does not.)
        row0 = pl.program_id(0) * tb
        r = jax.lax.broadcasted_iota(jnp.int32, (tb, nf), 0) + row0
        c = jax.lax.broadcasted_iota(jnp.int32, (tb, nf), 1)
        h = (r * nf + c).astype(jnp.uint32)
        h = h * jnp.uint32(0x9E3779B1) + seed_ref[0].astype(jnp.uint32)
        h = h ^ (h >> 16)
        h = h * jnp.uint32(0x7FEB352D)
        h = h ^ (h >> 15)
        h = h * jnp.uint32(0x846CA68B)
        h = h ^ (h >> 16)
        # Take the top 31 bits -> non-negative int32, signed compare.
        h31 = (h >> 1).astype(jnp.int32)
        keep_threshold = jnp.int32(int((1.0 - DROP_P) * (1 << 31)))
        keep = h31 < keep_threshold
        inv_keep = 1.0 / (1.0 - DROP_P)
        x = jnp.where(keep, x * jnp.asarray(inv_keep, x.dtype),
                      jnp.asarray(0.0, x.dtype))

    out = jnp.dot(x, w_ref[...], preferred_element_type=jnp.float32)
    out = out + b_ref[...]
    o_ref[...] = out.astype(o_ref.dtype)


def fc1_active_forward(x, w, b, *, training=False, seed=0, block_b=1024):
    """Pallas forward for FC1_active.

    x : (B, 784) float32
    w : (784, 10) float32   (transpose of PyTorch's (10, 784) weight)
    b : (10,)    float32
    Returns (B, 10) float32 logits.
    """
    B, F = x.shape
    assert F == IN_FEATURES, f"expected {IN_FEATURES} input features, got {F}"

    # Pad the output/weight lane dimension to 128 for unmasked stores.
    w_pad = jnp.zeros((IN_FEATURES, OUT_PAD), w.dtype).at[:, :OUT_FEATURES].set(w)
    b_pad = jnp.zeros((1, OUT_PAD), b.dtype).at[0, :OUT_FEATURES].set(b)

    # Batch tile: multiple of 8 sublanes, capped so double-buffered tiles fit
    # comfortably in scoped VMEM on v5e (16 MiB) / v7x (32 MiB).
    tb = min(block_b, _round_up(B, 8))
    b_padded = _round_up(B, tb)
    if b_padded != B:
        x = jnp.pad(x, ((0, b_padded - B), (0, 0)))
    num_blocks = b_padded // tb

    seed_arr = jnp.asarray([seed], dtype=jnp.int32)
    kernel = functools.partial(_fc1_kernel, apply_dropout=training)

    bytes_accessed = (b_padded * IN_FEATURES * 4      # x
                      + b_padded * OUT_PAD * 4        # out
                      + IN_FEATURES * OUT_PAD * 4     # W (resident, read once)
                      + OUT_PAD * 4)                  # bias

    out = pl.pallas_call(
        kernel,
        out_shape=jax.ShapeDtypeStruct((b_padded, OUT_PAD), jnp.float32),
        grid_spec=pltpu.PrefetchScalarGridSpec(
            num_scalar_prefetch=1,
            grid=(num_blocks,),
            in_specs=[
                pl.BlockSpec((tb, IN_FEATURES), lambda i, s: (i, 0)),
                pl.BlockSpec((IN_FEATURES, OUT_PAD), lambda i, s: (0, 0)),
                pl.BlockSpec((1, OUT_PAD), lambda i, s: (0, 0)),
            ],
            out_specs=pl.BlockSpec((tb, OUT_PAD), lambda i, s: (i, 0)),
        ),
        compiler_params=pltpu.CompilerParams(
            dimension_semantics=("parallel",)),
        cost_estimate=pl.CostEstimate(
            flops=2 * b_padded * IN_FEATURES * OUT_FEATURES,
            transcendentals=0,
            bytes_accessed=bytes_accessed),
    )(seed_arr, x, w_pad, b_pad)

    return out[:B, :OUT_FEATURES]


def _reference_forward(x, w, b):
    # eval-mode (dropout = identity) reference in plain JAX
    return x @ w + b[None, :]


if __name__ == "__main__":
    key = jax.random.PRNGKey(0)
    kx, kw, kb = jax.random.split(key, 3)

    B = 8
    # MNIST-like flattened input: (B, 1*28*28) = (B, 784)
    x = jax.random.normal(kx, (B, IN_FEATURES), dtype=jnp.float32)

    # Deterministic parameter init (PyTorch Linear uses U(-1/sqrt(fan_in), ..)).
    bound = 1.0 / (IN_FEATURES ** 0.5)
    w = jax.random.uniform(kw, (IN_FEATURES, OUT_FEATURES),
                           minval=-bound, maxval=bound, dtype=jnp.float32)
    b = jax.random.uniform(kb, (OUT_FEATURES,),
                           minval=-bound, maxval=bound, dtype=jnp.float32)

    fwd = jax.jit(fc1_active_forward, static_argnames=("training", "block_b"))

    # Eval mode (dropout is identity) -- compare against the JAX reference.
    out_eval = jax.block_until_ready(fwd(x, w, b, training=False))
    ref = _reference_forward(x, w, b)
    assert out_eval.shape == (B, OUT_FEATURES)
    assert jnp.allclose(out_eval, ref, atol=2e-3, rtol=2e-3), \
        float(jnp.max(jnp.abs(out_eval - ref)))

    # Training mode: in-kernel counter-hash dropout (Bernoulli(0.5), scale 2x).
    # Exact PyTorch RNG stream is not reproducible; semantics are.
    out_train = jax.block_until_ready(fwd(x, w, b, training=True, seed=1234))
    out_train2 = jax.block_until_ready(fwd(x, w, b, training=True, seed=1234))
    assert out_train.shape == (B, OUT_FEATURES)
    assert jnp.allclose(out_train, out_train2)  # deterministic for a fixed seed

    print("KERNEL_OK")
</pallas_src>

<mosaic_0001>
module attributes {stable_mosaic.version = 11 : i64} {
  func.func @_fc1_kernel(%arg0: i32, %arg1: memref<1xi32, #tpu.memory_space<smem>>, %arg2: memref<8x784xf32, #tpu.memory_space<vmem>>, %arg3: memref<784x128xf32, #tpu.memory_space<vmem>>, %arg4: memref<1x128xf32, #tpu.memory_space<vmem>>, %arg5: memref<8x128xf32, #tpu.memory_space<vmem>>) attributes {dimension_semantics = [#tpu.dimension_semantics<parallel>], iteration_bounds = array<i64: 1>, scalar_prefetch = 1 : i64, scratch_operands = 0 : i64, tpu.core_type = #tpu.core_type<tc>, window_params = [{transform_indices = @transform_0, window_bounds = array<i64: 8, 784>}, {pipeline_mode = #tpu.pipeline_mode<synchronous>, transform_indices = @transform_1, window_bounds = array<i64: 784, 128>}, {pipeline_mode = #tpu.pipeline_mode<synchronous>, transform_indices = @transform_2, window_bounds = array<i64: 1, 128>}, {transform_indices = @transform_3, window_bounds = array<i64: 8, 128>}]} {
    %c0 = arith.constant 0 : index
    %c0_0 = arith.constant 0 : index
    %0 = vector.load %arg2[%c0, %c0_0] : memref<8x784xf32, #tpu.memory_space<vmem>>, vector<8x784xf32>
    %c0_1 = arith.constant 0 : index
    %c0_2 = arith.constant 0 : index
    %1 = vector.load %arg3[%c0_1, %c0_2] : memref<784x128xf32, #tpu.memory_space<vmem>>, vector<784x128xf32>
    %cst = arith.constant dense<0.000000e+00> : vector<8x128xf32>
    %2 = tpu.matmul %0, %1, %cst {dimension_numbers = #tpu.dot_dimension_numbers<[1], [0], [0], [1], [0, 0, 1, 1], [], []>} : vector<8x784xf32>, vector<784x128xf32>, vector<8x128xf32> -> vector<8x128xf32>
    %c0_3 = arith.constant 0 : index
    %c0_4 = arith.constant 0 : index
    %3 = vector.load %arg4[%c0_3, %c0_4] : memref<1x128xf32, #tpu.memory_space<vmem>>, vector<1x128xf32>
    %4 = vector.broadcast %3 : vector<1x128xf32> to vector<8x128xf32>
    %5 = arith.addf %2, %4 : vector<8x128xf32>
    %c0_5 = arith.constant 0 : index
    %c0_6 = arith.constant 0 : index
    %6 = vector.load %arg5[%c0_5, %c0_6] : memref<8x128xf32, #tpu.memory_space<vmem>>, vector<8x128xf32>
    tpu.vector_store %arg5[%c0_5, %c0_6], %5 {strides = array<i32>} : memref<8x128xf32, #tpu.memory_space<vmem>>, vector<8x128xf32>,
    return
  }
  func.func @transform_0(%arg0: i32, %arg1: memref<1xi32, #tpu.memory_space<smem>>) -> (i32, i32) {
    %c0_i32 = arith.constant 0 : i32
    %c0_i32_0 = arith.constant 0 : i32
    return %arg0, %c0_i32 : i32, i32
  }
  func.func @transform_1(%arg0: i32, %arg1: memref<1xi32, #tpu.memory_space<smem>>) -> (i32, i32) {
    %c0_i32 = arith.constant 0 : i32
    %c0_i32_0 = arith.constant 0 : i32
    %c0_i32_1 = arith.constant 0 : i32
    return %c0_i32, %c0_i32_0 : i32, i32
  }
  func.func @transform_2(%arg0: i32, %arg1: memref<1xi32, #tpu.memory_space<smem>>) -> (i32, i32) {
    %c0_i32 = arith.constant 0 : i32
    %c0_i32_0 = arith.constant 0 : i32
    %c0_i32_1 = arith.constant 0 : i32
    return %c0_i32, %c0_i32_0 : i32, i32
  }
  func.func @transform_3(%arg0: i32, %arg1: memref<1xi32, #tpu.memory_space<smem>>) -> (i32, i32) {
    %c0_i32 = arith.constant 0 : i32
    %c0_i32_0 = arith.constant 0 : i32
    return %arg0, %c0_i32 : i32, i32
  }
}

</mosaic_0001>

<bundles_post_ra>
// kernel: fc1_active_forward.1
= control target key start
LH: loop header
LB: loop body
LE: loop exit
PB: predicated region body
PF: predicated region fallthrough
CT: control target
= control target key end

     0   :  { %s1031_s0 = inlined_call_operand.<no memory space> [shape: s32[1], index: 0, kind: input, shape index: {}]   ;;  %s1032_s1 = inlined_call_operand.vmem [shape: f32[8,784], index: 1, kind: input, shape index: {}]   ;;  %s1033_s2 = inlined_call_operand.vmem [shape: f32[784,128], index: 2, kind: input, shape index: {}]   ;;  %s1034_s3 = inlined_call_operand.vmem [shape: f32[1,128], index: 3, kind: input, shape index: {}]   ;;  %s1035_s4 = inlined_call_operand.hbm [shape: f32[8,128], index: 4, kind: output, shape index: {}]  }
   0x1   :  { %v40_v0 = vld [vmem:[%s1033_s2 + $0x80] sm:$0xff]  ;;  %v41_v1 = vld [vmem:[%s1033_s2 + $0x88] sm:$0xff]  ;;  %v42_v11 = vld [vmem:[%s1033_s2 + $0x90] sm:$0xff] }
   0x2   :  { %v24_v2 = vld [vmem:[%s1033_s2] sm:$0xff]  ;;  %v545_v3 = vpack.c.bf16 %v41_v1, %v40_v0  ;;  %v25_v4 = vld [vmem:[%s1033_s2 + $0x8] sm:$0xff]  ;;  %v43_v13 = vld [vmem:[%s1033_s2 + $0x98] sm:$0xff] }
   0x3   :  { %v72_v5 = vld [vmem:[%s1033_s2 + $0x180] sm:$0xff]  ;;  %v73_v6 = vld [vmem:[%s1033_s2 + $0x188] sm:$0xff]  ;;  %v547_v7 = vpack.c.bf16 %v25_v4, %v24_v2  ;;  %v26_v14 = vld [vmem:[%s1033_s2 + $0x10] sm:$0xff]  ;;  %v549_v16 = vpack.c.bf16 %v43_v13, %v42_v11 }
   0x4   :  { %v577_v8 = vpack.c.bf16 %v73_v6, %v72_v5  ;;  %v56_v9 = vld [vmem:[%s1033_s2 + $0x100] sm:$0xff]  ;;  %v57_v10 = vld [vmem:[%s1033_s2 + $0x108] sm:$0xff]  ;;  %546 = vmatprep.subr.bf16.mxu0 %v545_v3  ;;  %v27_v15 = vld [vmem:[%s1033_s2 + $0x18] sm:$0xff] }
   0x5   :  { %v579_v12 = vpack.c.bf16 %v57_v10, %v56_v9  ;;  %548 = vmatpush3.bf16.msra.mxu0 %v547_v7  ;;  %v551_v17 = vpack.c.bf16 %v27_v15, %v26_v14  ;;  %v74_v18 = vld [vmem:[%s1033_s2 + $0x190] sm:$0xff]  ;;  %v75_v19 = vld [vmem:[%s1033_s2 + $0x198] sm:$0xff]  ;;  %v44_v23 = vld [vmem:[%s1033_s2 + $0xa0] sm:$0xff] }
   0x6   :  { %578 = vmatprep.subr.bf16.mxu1 %v577_v8  ;;  %v58_v20 = vld [vmem:[%s1033_s2 + $0x110] sm:$0xff]  ;;  %v581_v21 = vpack.c.bf16 %v75_v19, %v74_v18  ;;  %v59_v22 = vld [vmem:[%s1033_s2 + $0x118] sm:$0xff]  ;;  %v45_v24 = vld [vmem:[%s1033_s2 + $0xa8] sm:$0xff]  ;;  %550 = vmatprep.subr.bf16.mxu0 %v549_v16 }
   0x7   :  { %580 = vmatpush3.bf16.msra.mxu1 %v579_v12  ;;  %v583_v25 = vpack.c.bf16 %v59_v22, %v58_v20  ;;  %v553_v26 = vpack.c.bf16 %v45_v24, %v44_v23  ;;  %v28_v27 = vld [vmem:[%s1033_s2 + $0x20] sm:$0xff]  ;;  %v29_v28 = vld [vmem:[%s1033_s2 + $0x28] sm:$0xff]  ;;  %v46_v35 = vld [vmem:[%s1033_s2 + $0xb0] sm:$0xff] }
   0x8   :  { %v76_v29 = vld [vmem:[%s1033_s2 + $0x1a0] sm:$0xff]  ;;  %582 = vmatprep.subr.bf16.mxu1 %v581_v21  ;;  %v77_v30 = vld [vmem:[%s1033_s2 + $0x1a8] sm:$0xff]  ;;  %v555_v33 = vpack.c.bf16 %v29_v28, %v28_v27  ;;  %v47_v36 = vld [vmem:[%s1033_s2 + $0xb8] sm:$0xff] }
   0x9   :  { %v60_v31 = vld [vmem:[%s1033_s2 + $0x120] sm:$0xff]  ;;  %v61_v32 = vld [vmem:[%s1033_s2 + $0x128] sm:$0xff]  ;;  %552 = vmatpush3.bf16.msra.mxu0 %v551_v17  ;;  %v585_v34 = vpack.c.bf16 %v77_v30, %v76_v29  ;;  %v30_v37 = vld [vmem:[%s1033_s2 + $0x30] sm:$0xff]  ;;  %v557_v39 = vpack.c.bf16 %v47_v36, %v46_v35 }
   0xa   :  { %554 = vmatprep.subr.bf16.mxu0 %v553_v26  ;;  %v587_v38 = vpack.c.bf16 %v61_v32, %v60_v31  ;;  %v31_v40 = vld [vmem:[%s1033_s2 + $0x38] sm:$0xff]  ;;  %v78_v41 = vld [vmem:[%s1033_s2 + $0x1b0] sm:$0xff]  ;;  %v48_v46 = vld [vmem:[%s1033_s2 + $0xc0] sm:$0xff] }
   0xb   :  { %584 = vmatpush3.bf16.msra.mxu1 %v583_v25  ;;  %v79_v42 = vld [vmem:[%s1033_s2 + $0x1b8] sm:$0xff]  ;;  %v62_v44 = vld [vmem:[%s1033_s2 + $0x130] sm:$0xff]  ;;  %v49_v47 = vld [vmem:[%s1033_s2 + $0xc8] sm:$0xff]  ;;  %v559_v48 = vpack.c.bf16 %v31_v40, %v30_v37 }
   0xc   :  { %586 = vmatprep.subr.bf16.mxu1 %v585_v34  ;;  %v589_v43 = vpack.c.bf16 %v79_v42, %v78_v41  ;;  %v63_v45 = vld [vmem:[%s1033_s2 + $0x138] sm:$0xff]  ;;  %v80_v49 = vld [vmem:[%s1033_s2 + $0x1c0] sm:$0xff]  ;;  %v81_v50 = vld [vmem:[%s1033_s2 + $0x1c8] sm:$0xff]  ;;  %v561_v52 = vpack.c.bf16 %v49_v47, %v48_v46 }
   0xd   :  { %556 = vmatpush3.bf16.msra.mxu0 %v555_v33  ;;  %v591_v51 = vpack.c.bf16 %v63_v45, %v62_v44  ;;  %v32_v53 = vld [vmem:[%s1033_s2 + $0x40] sm:$0xff]  ;;  %v33_v54 = vld [vmem:[%s1033_s2 + $0x48] sm:$0xff]  ;;  %v593_v56 = vpack.c.bf16 %v81_v50, %v80_v49  ;;  %v50_v58 = vld [vmem:[%s1033_s2 + $0xd0] sm:$0xff]  ;;  %v672_v50 = vmov 0.0|0.0  }
   0xe   :  { %558 = vmatprep.subr.bf16.mxu0 %v557_v39  ;;  %v64_v55 = vld [vmem:[%s1033_s2 + $0x140] sm:$0xff]  ;;  %v65_v57 = vld [vmem:[%s1033_s2 + $0x148] sm:$0xff]  ;;  %v51_v59 = vld [vmem:[%s1033_s2 + $0xd8] sm:$0xff]  ;;  %v563_v62 = vpack.c.bf16 %v33_v54, %v32_v53 }
   0xf   :  { %588 = vmatpush3.bf16.msra.mxu1 %v587_v38  ;;  %v82_v60 = vld [vmem:[%s1033_s2 + $0x1d0] sm:$0xff]  ;;  %v83_v61 = vld [vmem:[%s1033_s2 + $0x1d8] sm:$0xff]  ;;  %v595_v63 = vpack.c.bf16 %v65_v57, %v64_v55  ;;  %v565_v0 = vpack.c.bf16 %v51_v59, %v50_v58  ;;  %v52_v6 = vld [vmem:[%s1033_s2 + $0xe0] sm:$0xff] }
  0x10   :  { %590 = vmatprep.subr.bf16.mxu1 %v589_v43  ;;  %v34_v1 = vld [vmem:[%s1033_s2 + $0x50] sm:$0xff]  ;;  %v35_v2 = vld [vmem:[%s1033_s2 + $0x58] sm:$0xff]  ;;  %v597_v4 = vpack.c.bf16 %v83_v61, %v82_v60  ;;  %v53_v7 = vld [vmem:[%s1033_s2 + $0xe8] sm:$0xff] }
  0x11   :  { %560 = vmatpush3.bf16.msra.mxu0 %v559_v48  ;;  %v66_v3 = vld [vmem:[%s1033_s2 + $0x150] sm:$0xff]  ;;  %v67_v5 = vld [vmem:[%s1033_s2 + $0x158] sm:$0xff]  ;;  %v84_v8 = vld [vmem:[%s1033_s2 + $0x1e0] sm:$0xff]  ;;  %v567_v10 = vpack.c.bf16 %v35_v2, %v34_v1  ;;  %v569_v14 = vpack.c.bf16 %v53_v7, %v52_v6 }
  0x12   :  { %562 = vmatprep.subr.bf16.mxu0 %v561_v52  ;;  %v85_v9 = vld [vmem:[%s1033_s2 + $0x1e8] sm:$0xff]  ;;  %v36_v11 = vld [vmem:[%s1033_s2 + $0x60] sm:$0xff]  ;;  %v599_v13 = vpack.c.bf16 %v67_v5, %v66_v3  ;;  %v54_v19 = vld [vmem:[%s1033_s2 + $0xf0] sm:$0xff] }
  0x13   :  { %592 = vmatpush3.bf16.msra.mxu1 %v591_v51  ;;  %v18_v12 = vld [vmem:[%s1032_s1 + $0x8] sm:$0xff]  ;;  %v68_v16 = vld [vmem:[%s1033_s2 + $0x160] sm:$0xff]  ;;  %v601_v18 = vpack.c.bf16 %v85_v9, %v84_v8  ;;  %v55_v20 = vld [vmem:[%s1033_s2 + $0xf8] sm:$0xff] }
  0x14   :  { %594 = vmatprep.subr.bf16.mxu1 %v593_v56  ;;  %v37_v15 = vld [vmem:[%s1033_s2 + $0x68] sm:$0xff]  ;;  %197 = vmatprep.mubr.f32.mxu0 %v18_v12  ;;  %v20_v21 = vld [vmem:[%s1032_s1 + $0x18] sm:$0xff]  ;;  %v86_v22 = vld [vmem:[%s1033_s2 + $0x1f0] sm:$0xff]  ;;  %v573_v26 = vpack.c.bf16 %v55_v20, %v54_v19 }
  0x15   :  { %564 = vmatpush3.bf16.msra.mxu0 %v563_v62  ;;  %v69_v17 = vld [vmem:[%s1033_s2 + $0x168] sm:$0xff]  ;;  %v87_v23 = vld [vmem:[%s1033_s2 + $0x1f8] sm:$0xff]  ;;  %267 = vmatprep.mubr.f32.mxu1 %v20_v21  ;;  %v571_v24 = vpack.c.bf16 %v37_v15, %v36_v11  ;;  %v38_v27 = vld [vmem:[%s1033_s2 + $0x70] sm:$0xff] }
  0x16   :  { %566 = vmatprep.subr.bf16.mxu0 %v565_v0  ;;  %v603_v25 = vpack.c.bf16 %v69_v17, %v68_v16  ;;  %v39_v28 = vld [vmem:[%s1033_s2 + $0x78] sm:$0xff]  ;;  %v70_v29 = vld [vmem:[%s1033_s2 + $0x170] sm:$0xff]  ;;  %v605_v30 = vpack.c.bf16 %v87_v23, %v86_v22  ;;  %v104_v32 = vld [vmem:[%s1033_s2 + $0x280] sm:$0xff] }
  0x17   :  { %596 = vmatpush3.bf16.msra.mxu1 %v595_v63  ;;  %v71_v31 = vld [vmem:[%s1033_s2 + $0x178] sm:$0xff]  ;;  %v105_v33 = vld [vmem:[%s1033_s2 + $0x288] sm:$0xff]  ;;  %v575_v34 = vpack.c.bf16 %v39_v28, %v38_v27  ;;  %v88_v37 = vld [vmem:[%s1033_s2 + $0x200] sm:$0xff] }
  0x18   :  { %598 = vmatprep.subr.bf16.mxu1 %v597_v4  ;;  %v607_v35 = vpack.c.bf16 %v71_v31, %v70_v29  ;;  %v609_v36 = vpack.c.bf16 %v105_v33, %v104_v32  ;;  %v89_v38 = vld [vmem:[%s1033_s2 + $0x208] sm:$0xff]  ;;  %v106_v39 = vld [vmem:[%s1033_s2 + $0x290] sm:$0xff]  ;;  %v107_v40 = vld [vmem:[%s1033_s2 + $0x298] sm:$0xff] }
  0x19   :  { %568 = vmatpush3.bf16.msra.mxu0 %v567_v10  ;;  %v17_v41 = vld [vmem:[%s1032_s1] sm:$0xff]  ;;  %v611_v42 = vpack.c.bf16 %v89_v38, %v88_v37  ;;  %v19_v43 = vld [vmem:[%s1032_s1 + $0x10] sm:$0xff]  ;;  %v613_v45 = vpack.c.bf16 %v107_v40, %v106_v39  ;;  %v91_v46 = vld [vmem:[%s1033_s2 + $0x218] sm:$0xff] }
  0x1a   :  { %570 = vmatprep.subr.bf16.mxu0 %v569_v14  ;;  %v90_v44 = vld [vmem:[%s1033_s2 + $0x210] sm:$0xff]  ;;  %v108_v47 = vld [vmem:[%s1033_s2 + $0x2a0] sm:$0xff]  ;;  %v109_v48 = vld [vmem:[%s1033_s2 + $0x2a8] sm:$0xff] }
  0x1b   :  { %600 = vmatpush3.bf16.msra.mxu1 %v599_v13  ;;  %v22_v49 = vld [vmem:[%s1032_s1 + $0x28] sm:$0xff]  ;;  %v120_v51 = vld [vmem:[%s1033_s2 + $0x300] sm:$0xff] }
  0x1c   :  { %602 = vmatprep.subr.bf16.mxu1 %v601_v18  ;;  %v121_v52 = vld [vmem:[%s1033_s2 + $0x308] sm:$0xff] }
  0x1d   :  { %572 = vmatpush3.bf16.msra.mxu0 %v571_v24  ;;  %v642_v53 = vpack.c.bf16 %v121_v52, %v120_v51 }
  0x1e   :  { %574 = vmatprep.subr.bf16.mxu0 %v573_v26 }
  0x1f   :  { %604 = vmatpush3.bf16.msra.mxu1 %v603_v25 }
  0x20   :  { %606 = vmatprep.subr.bf16.mxu1 %v605_v30 }
  0x21   :  { %576 = vmatpush3.bf16.msra.mxu0 %v575_v34 }
  0x22   :  { %610 = vmatprep.subr.bf16.mxu0 %v609_v36 }
  0x23   :  { %608 = vmatpush3.bf16.msra.mxu1 %v607_v35 }
  0x24   :  { %641 = vmatprep.subr.bf16.mxu1 %v672_v50  ;;  %198 = vmatmul.mubr.f32.vlgmr.msra.gmra.mrb[0].mxu0 %v17_v41 }
  0x25   :  { %10 = vsyncpa [#allocation5], 0  ;;  %612 = vmatpush3.bf16.msra.mxu0 %v611_v42  ;;  %v615_v54 = vpack.c.bf16 %v91_v46, %v90_v44  ;;  %v617_v55 = vpack.c.bf16 %v109_v48, %v108_v47  ;;  %v92_v56 = vld [vmem:[%s1033_s2 + $0x220] sm:$0xff]  ;;  %v93_v57 = vld [vmem:[%s1033_s2 + $0x228] sm:$0xff]  ;;  %337 = vmatprep.mubr.f32.mxu0 %v22_v49  ;;  %vm673_vm0 = vmmov 0   ;;  %v674_v60 = vmov 0.0  }
  0x26   :  { %268 = vmatmul.mubr.f32.vlgmr.msra.gmra.mrb[0].mxu1 %v19_v43  ;;  %614 = vmatprep.subr.bf16.mxu0 %v613_v45  ;;  %v110_v58 = vld [vmem:[%s1033_s2 + $0x2b0] sm:$0xff]  ;;  %v111_v59 = vld [vmem:[%s1033_s2 + $0x2b8] sm:$0xff]  ;;  %vm129_vm1 = vcmask 130048   ;;  %v619_v62 = vpack.c.bf16 %v93_v57, %v92_v56  ;;  %v112_v2 = vld [vmem:[%s1033_s2 + $0x2c0] sm:$0xff] }
  0x27   :  { %643 = vmatpush3.bf16.msra.mxu1 %v642_v53  ;;  %542 = vmatprep.mubr.msk.f32.mxu1 %vm673_vm0, %v674_v60  ;;  %v23_v61 = vld [vmem:[%s1032_s1 + $0x30] sm:$0xff]  ;;  %v621_v63 = vpack.c.bf16 %v111_v59, %v110_v58  ;;  %v95_v1 = vld [vmem:[%s1033_s2 + $0x238] sm:$0xff]  ;;  %v113_v3 = vld [vmem:[%s1033_s2 + $0x2c8] sm:$0xff] }
  0x28   :  { %v94_v0 = vld [vmem:[%s1033_s2 + $0x230] sm:$0xff]  ;;  %v625_v5 = vpack.c.bf16 %v113_v3, %v112_v2  ;;  %v96_v6 = vld [vmem:[%s1033_s2 + $0x240] sm:$0xff]  ;;  %v97_v7 = vld [vmem:[%s1033_s2 + $0x248] sm:$0xff] }
  0x29   :  { %616 = vmatpush3.bf16.msra.mxu0 %v615_v54  ;;  %v623_v4 = vpack.c.bf16 %v95_v1, %v94_v0  ;;  %v114_v8 = vld [vmem:[%s1033_s2 + $0x2d0] sm:$0xff]  ;;  %v115_v9 = vld [vmem:[%s1033_s2 + $0x2d8] sm:$0xff]  ;;  %v627_v10 = vpack.c.bf16 %v97_v7, %v96_v6  ;;  %v116_v14 = vld [vmem:[%s1033_s2 + $0x2e0] sm:$0xff] }
  0x2a   :  { %618 = vmatprep.subr.bf16.mxu0 %v617_v55  ;;  %543 = vmatmul.mubr.msk.f32.vlgmr.msra.gmra.mrb[2].mxu1 %vm129_vm1, %v23_v61  ;;  %v629_v11 = vpack.c.bf16 %v115_v9, %v114_v8  ;;  %v98_v12 = vld [vmem:[%s1033_s2 + $0x250] sm:$0xff]  ;;  %v99_v13 = vld [vmem:[%s1033_s2 + $0x258] sm:$0xff]  ;;  %v117_v15 = vld [vmem:[%s1033_s2 + $0x2e8] sm:$0xff] }
  0x2b   :  { %v631_v16 = vpack.c.bf16 %v99_v13, %v98_v12  ;;  %v633_v17 = vpack.c.bf16 %v117_v15, %v116_v14  ;;  %v100_v18 = vld [vmem:[%s1033_s2 + $0x260] sm:$0xff]  ;;  %v101_v19 = vld [vmem:[%s1033_s2 + $0x268] sm:$0xff]  ;;  %v118_v20 = vld [vmem:[%s1033_s2 + $0x2f0] sm:$0xff] }
  0x2c   :  { %v119_v21 = vld [vmem:[%s1033_s2 + $0x2f8] sm:$0xff]  ;;  %v635_v22 = vpack.c.bf16 %v101_v19, %v100_v18  ;;  %v102_v24 = vld [vmem:[%s1033_s2 + $0x270] sm:$0xff]  ;;  %v21_v27 = vld [vmem:[%s1032_s1 + $0x20] sm:$0xff] }
  0x2d   :  { %620 = vmatpush3.bf16.msra.mxu0 %v619_v62  ;;  %v637_v23 = vpack.c.bf16 %v119_v21, %v118_v20  ;;  %v103_v25 = vld [vmem:[%s1033_s2 + $0x278] sm:$0xff]  ;;  %v428_v29 = vld [vmem:[%s1034_s3] ss:$0 sm:$0xff]  ;;  %s675_s2 = smov [#allocation4]  }
  0x2e   :  { %622 = vmatprep.subr.bf16.mxu0 %v621_v63  ;;  %v639_v26 = vpack.c.bf16 %v103_v25, %v102_v24  ;;  %s420_s1 = sshll.u32 %s675_s2, 4  ;;  %s421_s1 = int_to_ptr.vmem [resolvable:$true] %s420_s1 }
  0x2f   :  { %s648_s11 = scalar_lea.vmem %s421_s1, 128  ;;  %p653_p1 = scmp.lt.s32.totalorder %s421_s1, %s421_s1 }
  0x30   :  { %p649_p0 = scmp.ne.s32.totalorder %s421_s1, %s648_s11  ;;  %p654_p2 = scmp.lt.s32.totalorder %s648_s11, %s648_s11 }
  0x31   :  { %624 = vmatpush3.bf16.msra.mxu0 %v623_v4 }
  0x32   :  { %626 = vmatprep.subr.bf16.mxu0 %v625_v5  ;;  %p655_p3 = por %p654_p2, %p653_p1 }
  0x34   :  { %p656_p4 = pnand %p655_p3, %p649_p0 }
  0x35   :  { %628 = vmatpush3.bf16.msra.mxu0 %v627_v10 }
  0x36   :  { %630 = vmatprep.subr.bf16.mxu0 %v629_v11 }
  0x39   :  { %632 = vmatpush3.bf16.msra.mxu0 %v631_v16 }
  0x3a   :  { %634 = vmatprep.subr.bf16.mxu0 %v633_v17 }
  0x3d   :  { %636 = vmatpush3.bf16.msra.mxu0 %v635_v22 }
  0x3e   :  { %638 = vmatprep.subr.bf16.mxu0 %v637_v23 }
  0x41   :  { %640 = vmatpush3.bf16.msra.mxu0 %v639_v26 }
  0x44   :  { %338 = vmatmul.mubr.f32.vlgmr.msra.gmra.mrb[2].mxu0 %v21_v27 }
  0xf7   :  { %v462_v28 = vpop.f32.mrb[0].mxu0 }
  0xf8   :  { %v463_v30 = vpop.f32.mrb[1].mxu0 }
  0xf9   :  { %v497_v31 = vpop.f32.mrb[0].mxu1  ;;  %v464_v32 = vadd.f32 %v463_v30, %v462_v28 }
  0xfa   :  { %v498_v33 = vpop.f32.mrb[1].mxu1 }
  0xfb   :  { %v499_v34 = vadd.f32 %v498_v33, %v497_v31  ;;  %v200_v35 = vadd.f32 %v464_v32, %v428_v29 }
  0xfd   :  { %v270_v36 = vadd.f32 %v499_v34, %v200_v35  ;;  %v409_v37 = vpop.f32.mrb[2].mxu1 }
  0xfe   :  { %v544_v38 = vpop.f32.mrb[3].mxu1 }
 0x117   :  { %v532_v39 = vpop.f32.mrb[2].mxu0 }
 0x118   :  { %v533_v40 = vpop.f32.mrb[3].mxu0 }
 0x119   :  { %v534_v41 = vadd.f32 %v533_v40, %v532_v39 }
 0x11b   :  { %v340_v42 = vadd.f32 %v534_v41, %v270_v36 }
 0x11d   :  { %v410_v43 = vadd.f32 %v409_v37, %v340_v42 }
 0x11f   :  { %413 = vst [vmem:[#allocation4] sm:$0xff] %v410_v43 }
 0x120   :  { %659 = shalt.err (!%p656_p4)
}
 0x121   :  { %s660_s13 = scalar_lea.hbm %s1035_s4, 128 }
 0x122   :  { %p661_p5 = scmp.ne.s32.totalorder %s1035_s4, %s660_s13  ;;  %p664_p6 = scmp.lt.u32.totalorder %s660_s13, %s1035_s4 }
 0x124   :  { %p666_p7 = pnand %p664_p6, %p661_p5 }
 0x126   :  { %669 = shalt.err (!%p666_p7)
}
 0x127   :  { %423 = dma.vmem_to_hbm [thread:$0]  %s421_s1, 128, %s1035_s4, [#allocation5]  }
 0x128   :  { %670 = dma.done.wait [#allocation5], 128  }
 0x129   :  { %671 = vsyncadd [#allocation5], 4294967168 }
 0x12a   :  { %427 = vsyncpa [#allocation5], 1 }

</bundles_post_ra>
